<compile_context>
chip_gen: v7x
topology: tpu7x:2x2x1
jax: 0.10.0
libtpu: 0.0.40
codegen_flags: <defaults>
</compile_context>

<pallas_src>
import functools
import math

import jax
import jax.numpy as jnp
from jax.experimental import pallas as pl
from jax.experimental.pallas import tpu as pltpu

_SQRT1_2 = 0.7071067811865476


def _gelu_exact(x):
    # Exact erf GELU (matches torch.nn.GELU() default).  Keep math in f32.
    return 0.5 * x * (1.0 + jax.lax.erf(x * _SQRT1_2))


def _geglu_kernel_fullk(x_ref, w0_ref, w1_ref, o_ref):
    """Full-K variant: 2-D (i, j) grid, whole reduction in one dot pair."""
    x = x_ref[...]
    g = jnp.dot(x, w0_ref[...], preferred_element_type=jnp.float32)
    lin = jnp.dot(x, w1_ref[...], preferred_element_type=jnp.float32)
    o_ref[...] = (_gelu_exact(g) * lin).astype(o_ref.dtype)


def _geglu_kernel_ksplit(x_ref, w0_ref, w1_ref, o_ref, acc0_ref, acc1_ref, *,
                         tk, x_resident):
    """K-split variant: 3-D (i, j, k) grid with two resident f32 accumulators."""
    k = pl.program_id(2)
    if x_resident:
        # x block is the full (tm, Kp) row panel, resident across j and k;
        # slice out the 128-aligned (tm, tk) chunk for this K step.
        start = pl.multiple_of(k * tk, tk)
        x = x_ref[:, pl.ds(start, tk)]
    else:
        x = x_ref[...]

    p0 = jnp.dot(x, w0_ref[...], preferred_element_type=jnp.float32)
    p1 = jnp.dot(x, w1_ref[...], preferred_element_type=jnp.float32)

    @pl.when(k == 0)
    def _():  # write directly -- no zero-init + read-modify-write
        acc0_ref[...] = p0
        acc1_ref[...] = p1

    @pl.when(k > 0)
    def _():
        acc0_ref[...] += p0
        acc1_ref[...] += p1

    @pl.when(k == pl.num_programs(2) - 1)
    def _():
        g = acc0_ref[...]
        o_ref[...] = (_gelu_exact(g) * acc1_ref[...]).astype(o_ref.dtype)


def _round_up(a, b):
    return ((a + b - 1) // b) * b


def _vmem_budget_bytes():
    try:
        phys = int(pltpu.get_tpu_info().vmem_capacity_bytes)
    except Exception:
        phys = 64 * 1024 * 1024  # conservative: v7x per-TensorCore VMEM
    # ~25% headroom for Mosaic internal scratch:
    #   ~48 MiB usable on v7x, ~96 MiB on v5e/v6e.
    return (phys * 3) // 4


def geglu(x, w0, w1, *, tm=None, tn=None, tk=None, x_resident=None):
    """GeGLU forward: GELU(x @ w0) * (x @ w1).

    x:  (..., embed_dim)
    w0: (embed_dim, ffn_dim)   == PyTorch wi_0.weight.T
    w1: (embed_dim, ffn_dim)   == PyTorch wi_1.weight.T
    returns (..., ffn_dim)
    """
    orig_shape = x.shape
    K = orig_shape[-1]
    M = math.prod(orig_shape[:-1]) if len(orig_shape) > 1 else 1
    N = w0.shape[1]

    x_isz = x.dtype.itemsize
    w_isz = w0.dtype.itemsize
    o_isz = x.dtype.itemsize
    budget = _vmem_budget_bytes()

    # ---------------- tile selection ----------------------------------------
    sub = max(8, 32 // x_isz)  # dtype-aware sublane multiple (8 f32 / 16 bf16)
    if tm is None:
        tm = min(512, _round_up(M, sub))
    else:
        tm = _round_up(tm, sub)
    if tn is None:
        tn = min(512, _round_up(N, 128))
        # Decode-sized calls (single M block): keep >=2 N blocks so both v7x
        # TensorCores get work on the parallel axes.
        if _round_up(M, tm) == tm and N > 128 and _round_up(N, tn) == tn:
            tn = _round_up((N + 1) // 2, 128)
    else:
        tn = _round_up(tn, 128)

    Kp0 = _round_up(K, 128)

    def ws_full(tk_):  # 2-D grid: no accumulator scratch, double-buffered tiles
        return 2 * tm * tk_ * x_isz + 4 * tk_ * tn * w_isz + 2 * tm * tn * o_isz

    def ws_split(tk_, resident):  # 3-D grid: + two (tm, tn) f32 accumulators
        kp = _round_up(K, tk_)
        xblk = tm * (kp if resident else tk_)
        return (2 * xblk * x_isz + 4 * tk_ * tn * w_isz
                + 2 * tm * tn * o_isz + 8 * tm * tn)

    if tk is not None:
        tk = min(_round_up(tk, 128), Kp0)

    if tk is None:
        if ws_full(Kp0) <= budget:
            tk, mode = Kp0, "full"
        else:
            cands = [c for c in (2048, 1024, 512, 256, 128) if c < Kp0]
            tk, mode = None, None
            if x_resident is not False:  # prefer x resident across the N axis
                for c in cands:
                    if ws_split(c, True) <= budget:
                        tk, mode = c, "resident"
                        break
            if tk is None and x_resident is not True:
                for c in cands:
                    if ws_split(c, False) <= budget:
                        tk, mode = c, "stream"
                        break
            if tk is None:  # last resort: tiny working set always fits
                tk = 128
                mode = "resident" if x_resident is True else "stream"
    else:
        if tk >= Kp0:
            tk, mode = Kp0, "full"
        elif x_resident is True:
            mode = "resident"
        elif x_resident is False:
            mode = "stream"
        else:
            mode = "resident" if ws_split(tk, True) <= budget else "stream"

    Mp = _round_up(M, tm)
    Np = _round_up(N, tn)
    Kp = _round_up(K, tk)

    # ---------------- padding (zero K-padding contributes nothing) ----------
    x2d = x.reshape(M, K)
    if (Mp, Kp) != (M, K):
        x2d = jnp.pad(x2d, ((0, Mp - M), (0, Kp - K)))
    if (Kp, Np) != (K, N):
        w0 = jnp.pad(w0, ((0, Kp - K), (0, Np - N)))
        w1 = jnp.pad(w1, ((0, Kp - K), (0, Np - N)))

    cost = pl.CostEstimate(
        flops=4 * M * N * K,          # two M*N*K matmuls, 2 flops/MAC
        transcendentals=M * N,        # one erf per output element
        bytes_accessed=(Mp * Kp * x_isz + 2 * Kp * Np * w_isz + Mp * Np * o_isz),
    )
    vmem_limit = int(budget)

    # ---------------- specs / grid -------------------------------------------
    if mode == "full":
        grid = (Mp // tm, Np // tn)
        in_specs = [
            pl.BlockSpec((tm, Kp), lambda i, j: (i, 0)),   # x row panel
            pl.BlockSpec((Kp, tn), lambda i, j: (0, j)),   # w0 column panel
            pl.BlockSpec((Kp, tn), lambda i, j: (0, j)),   # w1 column panel
        ]
        out_spec = pl.BlockSpec((tm, tn), lambda i, j: (i, j))
        scratch = []
        kernel = _geglu_kernel_fullk
        semantics = ("parallel", "parallel")
    else:
        grid = (Mp // tm, Np // tn, Kp // tk)
        if mode == "resident":
            x_spec = pl.BlockSpec((tm, Kp), lambda i, j, k: (i, 0))
        else:
            x_spec = pl.BlockSpec((tm, tk), lambda i, j, k: (i, k))
        in_specs = [
            x_spec,
            pl.BlockSpec((tk, tn), lambda i, j, k: (k, j)),
            pl.BlockSpec((tk, tn), lambda i, j, k: (k, j)),
        ]
        out_spec = pl.BlockSpec((tm, tn), lambda i, j, k: (i, j))
        scratch = [pltpu.VMEM((tm, tn), jnp.float32),
                   pltpu.VMEM((tm, tn), jnp.float32)]
        kernel = functools.partial(_geglu_kernel_ksplit, tk=tk,
                                   x_resident=(mode == "resident"))
        semantics = ("parallel", "parallel", "arbitrary")

    out = pl.pallas_call(
        kernel,
        out_shape=jax.ShapeDtypeStruct((Mp, Np), x.dtype),
        grid_spec=pltpu.PrefetchScalarGridSpec(
            num_scalar_prefetch=0,
            grid=grid,
            in_specs=in_specs,
            out_specs=out_spec,
            scratch_shapes=scratch,
        ),
        compiler_params=pltpu.CompilerParams(
            dimension_semantics=semantics,
            vmem_limit_bytes=vmem_limit,
        ),
        cost_estimate=cost,
    )(x2d, w0, w1)

    out = out[:M, :N]
    return out.reshape(*orig_shape[:-1], N)


if __name__ == "__main__":
    # Small shapes consistent with the module: batch=2, seq=8, embed=32, ffn=64.
    batch, seq, embed_dim, ffn_dim = 2, 8, 32, 64
    key = jax.random.PRNGKey(0)
    kx, k0, k1 = jax.random.split(key, 3)

    x = jax.random.normal(kx, (batch, seq, embed_dim), dtype=jnp.float32)
    # PyTorch nn.Linear weight is (ffn, embed); we keep the transposed layout.
    w0 = jax.random.normal(k0, (embed_dim, ffn_dim), dtype=jnp.float32) * (
        1.0 / math.sqrt(embed_dim))
    w1 = jax.random.normal(k1, (embed_dim, ffn_dim), dtype=jnp.float32) * (
        1.0 / math.sqrt(embed_dim))

    hi = jax.lax.Precision.HIGHEST

    def ref_geglu(xx, a, b):
        return (jax.nn.gelu(jnp.dot(xx, a, precision=hi), approximate=False)
                * jnp.dot(xx, b, precision=hi))

    # Loose tolerance: the MXU may run f32 matmuls with bf16-pass default
    # precision; structural bugs would produce O(1) errors, far above this.
    TOL = dict(atol=2e-2, rtol=2e-2)

    # 1) Default path: K fits a single block -> 2-D fully parallel grid.
    out = jax.block_until_ready(geglu(x, w0, w1))
    ref = ref_geglu(x, w0, w1)
    assert out.shape == (batch, seq, ffn_dim)
    assert jnp.allclose(out, ref, **TOL), "full-K path mismatch vs reference"

    # 2) K-split paths (x-resident and x-streamed) with forced small tiles so
    #    the reduction axis actually splits; validates both code branches.
    e2, f2 = 256, 256
    x2 = jax.random.normal(kx, (batch, seq, e2), dtype=jnp.float32)
    w02 = jax.random.normal(k0, (e2, f2), dtype=jnp.float32) * (1.0 / math.sqrt(e2))
    w12 = jax.random.normal(k1, (e2, f2), dtype=jnp.float32) * (1.0 / math.sqrt(e2))
    ref2 = ref_geglu(x2, w02, w12)

    out2a = jax.block_until_ready(
        geglu(x2, w02, w12, tm=16, tn=128, tk=128, x_resident=True))
    assert jnp.allclose(out2a, ref2, **TOL), "K-split (x-resident) mismatch"

    out2b = jax.block_until_ready(
        geglu(x2, w02, w12, tm=16, tn=128, tk=128, x_resident=False))
    assert jnp.allclose(out2b, ref2, **TOL), "K-split (x-streamed) mismatch"

    print("KERNEL_OK")
</pallas_src>

<mosaic_0001>
module attributes {stable_mosaic.version = 11 : i64} {
  func.func @_geglu_kernel_fullk(%arg0: i32, %arg1: i32, %arg2: memref<16x128xf32, #tpu.memory_space<vmem>>, %arg3: memref<128x128xf32, #tpu.memory_space<vmem>>, %arg4: memref<128x128xf32, #tpu.memory_space<vmem>>, %arg5: memref<16x128xf32, #tpu.memory_space<vmem>>) attributes {dimension_semantics = [#tpu.dimension_semantics<parallel>, #tpu.dimension_semantics<parallel>], iteration_bounds = array<i64: 1, 1>, scalar_prefetch = 0 : i64, scratch_operands = 0 : i64, tpu.core_type = #tpu.core_type<tc>, window_params = [{transform_indices = @transform_0, window_bounds = array<i64: 16, 128>}, {transform_indices = @transform_1, window_bounds = array<i64: 128, 128>}, {transform_indices = @transform_2, window_bounds = array<i64: 128, 128>}, {transform_indices = @transform_3, window_bounds = array<i64: 16, 128>}]} {
    %c0 = arith.constant 0 : index
    %c0_0 = arith.constant 0 : index
    %0 = vector.load %arg2[%c0, %c0_0] : memref<16x128xf32, #tpu.memory_space<vmem>>, vector<16x128xf32>
    %c0_1 = arith.constant 0 : index
    %c0_2 = arith.constant 0 : index
    %1 = vector.load %arg3[%c0_1, %c0_2] : memref<128x128xf32, #tpu.memory_space<vmem>>, vector<128x128xf32>
    %cst = arith.constant dense<0.000000e+00> : vector<16x128xf32>
    %2 = tpu.matmul %0, %1, %cst {dimension_numbers = #tpu.dot_dimension_numbers<[1], [0], [0], [1], [0, 0, 1, 1], [], []>} : vector<16x128xf32>, vector<128x128xf32>, vector<16x128xf32> -> vector<16x128xf32>
    %c0_3 = arith.constant 0 : index
    %c0_4 = arith.constant 0 : index
    %3 = vector.load %arg4[%c0_3, %c0_4] : memref<128x128xf32, #tpu.memory_space<vmem>>, vector<128x128xf32>
    %cst_5 = arith.constant dense<0.000000e+00> : vector<16x128xf32>
    %4 = tpu.matmul %0, %3, %cst_5 {dimension_numbers = #tpu.dot_dimension_numbers<[1], [0], [0], [1], [0, 0, 1, 1], [], []>} : vector<16x128xf32>, vector<128x128xf32>, vector<16x128xf32> -> vector<16x128xf32>
    %cst_6 = arith.constant 5.000000e-01 : f32
    %5 = vector.broadcast %cst_6 : f32 to vector<16x128xf32>
    %6 = arith.mulf %5, %2 : vector<16x128xf32>
    %cst_7 = arith.constant 0.707106769 : f32
    %7 = vector.broadcast %cst_7 : f32 to vector<16x128xf32>
    %8 = arith.mulf %2, %7 : vector<16x128xf32>
    %9 = math.erf %8 : vector<16x128xf32>
    %cst_8 = arith.constant 1.000000e+00 : f32
    %10 = vector.broadcast %cst_8 : f32 to vector<16x128xf32>
    %11 = arith.addf %10, %9 : vector<16x128xf32>
    %12 = arith.mulf %6, %11 : vector<16x128xf32>
    %13 = arith.mulf %12, %4 : vector<16x128xf32>
    %c0_9 = arith.constant 0 : index
    %c0_10 = arith.constant 0 : index
    %14 = vector.load %arg5[%c0_9, %c0_10] : memref<16x128xf32, #tpu.memory_space<vmem>>, vector<16x128xf32>
    tpu.vector_store %arg5[%c0_9, %c0_10], %13 {strides = array<i32>} : memref<16x128xf32, #tpu.memory_space<vmem>>, vector<16x128xf32>,
    return
  }
  func.func @transform_0(%arg0: i32, %arg1: i32) -> (i32, i32) {
    %c0_i32 = arith.constant 0 : i32
    %c0_i32_0 = arith.constant 0 : i32
    return %arg0, %c0_i32 : i32, i32
  }
  func.func @transform_1(%arg0: i32, %arg1: i32) -> (i32, i32) {
    %c0_i32 = arith.constant 0 : i32
    %c0_i32_0 = arith.constant 0 : i32
    return %c0_i32, %arg1 : i32, i32
  }
  func.func @transform_2(%arg0: i32, %arg1: i32) -> (i32, i32) {
    %c0_i32 = arith.constant 0 : i32
    %c0_i32_0 = arith.constant 0 : i32
    return %c0_i32, %arg1 : i32, i32
  }
  func.func @transform_3(%arg0: i32, %arg1: i32) -> (i32, i32) {
    %c0_i32 = arith.constant 0 : i32
    return %arg0, %arg1 : i32, i32
  }
}

</mosaic_0001>

<bundles_post_ra>
// kernel: tpu_custom_call.1
= control target key start
LH: loop header
LB: loop body
LE: loop exit
PB: predicated region body
PF: predicated region fallthrough
CT: control target
= control target key end

     0   :  { %8 = vsyncpa [#allocation3], 0  ;;  %s639_s0 = inlined_call_operand.hbm [shape: f32[16,128], index: 0, kind: input, shape index: {}]   ;;  %s640_s1 = inlined_call_operand.hbm [shape: f32[128,128], index: 1, kind: input, shape index: {}]   ;;  %s641_s2 = inlined_call_operand.hbm [shape: f32[128,128], index: 2, kind: input, shape index: {}]   ;;  %s642_s3 = inlined_call_operand.hbm [shape: f32[16,128], index: 3, kind: output, shape index: {}]  }
   0x1   :  { %9 = vsyncpa [#allocation6], 0 }
   0x2   :  { %10 = vsyncpa [#allocation4], 0  ;;  %s546_s12 = smov [#allocation5]   ;;  %s547_s14 = smov [#allocation2]  }
   0x3   :  { %s28_s13 = sshll.u32 %s546_s12, 4  ;;  %s16_s15 = sshll.u32 %s547_s14, 4  ;;  %s29_s13 = int_to_ptr.vmem [resolvable:$true] %s28_s13  ;;  %s572_s15 = int_to_ptr.vmem [resolvable:$true] %s16_s15 }
   0x4   :  { %s452_s18 = scalar_lea.hbm %s640_s1, 2048 }
   0x5   :  { %p453_p0 = scmp.ne.s32.totalorder %s640_s1, %s452_s18  ;;  %p456_p1 = scmp.lt.u32.totalorder %s452_s18, %s640_s1 }
   0x7   :  { %p458_p2 = pnand %p456_p1, %p453_p0 }
   0x9   :  { %461 = shalt.err (!%p458_p2)
}
   0xa   :  { %s462_s23 = scalar_lea.vmem %s29_s13, 2048  ;;  %p467_p4 = scmp.lt.s32.totalorder %s29_s13, %s29_s13 }
   0xb   :  { %p463_p3 = scmp.ne.s32.totalorder %s29_s13, %s462_s23  ;;  %p468_p5 = scmp.lt.s32.totalorder %s462_s23, %s462_s23 }
   0xd   :  { %p469_p6 = por %p468_p5, %p467_p4 }
   0xf   :  { %p470_p7 = pnand %p469_p6, %p463_p3 }
  0x11   :  { %473 = shalt.err (!%p470_p7)
}
  0x12   :  { %s548_s24 = smov 128   ;;  %s549_s25 = smov 8  }
  0x13   :  { %34 = dma.hbm_to_vmem [thread:$0]  %s640_s1, 2048, %s29_s13, [#allocation6], %s548_s24, %s548_s24, %s549_s25  }
  0x14   :  { %s474_s30 = scalar_lea.hbm %s639_s0, 256 }
  0x15   :  { %p475_p8 = scmp.ne.s32.totalorder %s639_s0, %s474_s30  ;;  %p478_p9 = scmp.lt.u32.totalorder %s474_s30, %s639_s0 }
  0x17   :  { %p480_p10 = pnand %p478_p9, %p475_p8 }
  0x19   :  { %483 = shalt.err (!%p480_p10)
}
  0x1a   :  { %s484_s8 = scalar_lea.vmem %s572_s15, 256  ;;  %p489_p12 = scmp.lt.s32.totalorder %s572_s15, %s572_s15 }
  0x1b   :  { %p485_p11 = scmp.ne.s32.totalorder %s572_s15, %s484_s8  ;;  %p490_p13 = scmp.lt.s32.totalorder %s484_s8, %s484_s8 }
  0x1d   :  { %p491_p0 = por %p490_p13, %p489_p12 }
  0x1f   :  { %p492_p1 = pnand %p491_p0, %p485_p11 }
  0x21   :  { %495 = shalt.err (!%p492_p1)
}
  0x22   :  { %22 = dma.hbm_to_vmem [thread:$0]  %s639_s0, 256, %s572_s15, [#allocation3], %s548_s24, %s548_s24, %s549_s25  }
  0x23   :  { %s550_s10 = smov [#allocation7]   ;;  %s496_s14 = scalar_lea.hbm %s641_s2, 2048 }
  0x24   :  { %s40_s11 = sshll.u32 %s550_s10, 4  ;;  %p497_p2 = scmp.ne.s32.totalorder %s641_s2, %s496_s14  ;;  %s41_s11 = int_to_ptr.vmem [resolvable:$true] %s40_s11 }
  0x25   :  { %p500_p3 = scmp.lt.u32.totalorder %s496_s14, %s641_s2 }
  0x27   :  { %p502_p4 = pnand %p500_p3, %p497_p2 }
  0x29   :  { %505 = shalt.err (!%p502_p4)
}
  0x2a   :  { %s506_s20 = scalar_lea.vmem %s41_s11, 2048  ;;  %p511_p6 = scmp.lt.s32.totalorder %s41_s11, %s41_s11 }
  0x2b   :  { %p507_p5 = scmp.ne.s32.totalorder %s41_s11, %s506_s20  ;;  %p512_p7 = scmp.lt.s32.totalorder %s506_s20, %s506_s20 }
  0x2d   :  { %p513_p8 = por %p512_p7, %p511_p6 }
  0x2f   :  { %p514_p9 = pnand %p513_p8, %p507_p5 }
  0x31   :  { %517 = shalt.err (!%p514_p9)
}
  0x32   :  { %46 = dma.hbm_to_vmem [thread:$0]  %s641_s2, 2048, %s41_s11, [#allocation6], %s548_s24, %s548_s24, %s549_s25  }
  0x33   :  { %540 = dma.done.wait [#allocation3], 256  }
  0x34   :  { %541 = vsyncadd [#allocation3], 4294967040 }
  0x35   :  { %542 = dma.done.wait [#allocation6], 4096  }
  0x36   :  { %543 = vsyncadd [#allocation6], 4294963200  ;;  %v58_v0 = vld [vmem:[#allocation5] sm:$0xff]  ;;  %v59_v1 = vld [vmem:[#allocation5 + $0x8] sm:$0xff]  ;;  %s551_s2 = smov [#allocation8]  }
  0x37   :  { %v60_v2 = vld [vmem:[#allocation5 + $0x10] sm:$0xff]  ;;  %v378_v3 = vpack.c.bf16 %v59_v1, %v58_v0  ;;  %v61_v4 = vld [vmem:[#allocation5 + $0x18] sm:$0xff]  ;;  %v62_v6 = vld [vmem:[#allocation5 + $0x20] sm:$0xff]  ;;  %s259_s21 = sshll.u32 %s551_s2, 4  ;;  %s260_s21 = int_to_ptr.vmem [resolvable:$true] %s259_s21 }
  0x38   :  { %v382_v5 = vpack.c.bf16 %v61_v4, %v60_v2  ;;  %v63_v7 = vld [vmem:[#allocation5 + $0x28] sm:$0xff]  ;;  %v149_v8 = vld [vmem:[#allocation7] sm:$0xff]  ;;  %v151_v11 = vld [vmem:[#allocation7 + $0x10] sm:$0xff]  ;;  %s518_s22 = scalar_lea.vmem %s260_s21, 256  ;;  %p523_p11 = scmp.lt.s32.totalorder %s260_s21, %s260_s21 }
  0x39   :  { %379 = vmatprep.subr.bf16.mxu0 %v378_v3  ;;  %v150_v9 = vld [vmem:[#allocation7 + $0x8] sm:$0xff]  ;;  %v386_v12 = vpack.c.bf16 %v63_v7, %v62_v6  ;;  %v64_v13 = vld [vmem:[#allocation5 + $0x30] sm:$0xff]  ;;  %v152_v14 = vld [vmem:[#allocation7 + $0x18] sm:$0xff]  ;;  %p519_p10 = scmp.ne.s32.totalorder %s260_s21, %s518_s22  ;;  %p524_p12 = scmp.lt.s32.totalorder %s518_s22, %s518_s22 }
  0x3a   :  { %381 = vmatpush3.bf16.msra.mxu0 %v378_v3  ;;  %v410_v10 = vpack.c.bf16 %v150_v9, %v149_v8  ;;  %v65_v15 = vld [vmem:[#allocation5 + $0x38] sm:$0xff]  ;;  %v414_v16 = vpack.c.bf16 %v152_v14, %v151_v11  ;;  %v153_v17 = vld [vmem:[#allocation7 + $0x20] sm:$0xff]  ;;  %v154_v18 = vld [vmem:[#allocation7 + $0x28] sm:$0xff] }
  0x3b   :  { %383 = vmatprep.subr.bf16.mxu0 %v382_v5  ;;  %v418_v19 = vpack.c.bf16 %v154_v18, %v153_v17  ;;  %v56_v20 = vld [vmem:[#allocation2] sm:$0xff]  ;;  %v390_v21 = vpack.c.bf16 %v65_v15, %v64_v13  ;;  %v156_v23 = vld [vmem:[#allocation7 + $0x38] sm:$0xff]  ;;  %v66_v24 = vld [vmem:[#allocation5 + $0x40] sm:$0xff]  ;;  %p525_p13 = por %p524_p12, %p523_p11 }
  0x3c   :  { %411 = vmatprep.subr.bf16.mxu1 %v410_v10  ;;  %v155_v22 = vld [vmem:[#allocation7 + $0x30] sm:$0xff]  ;;  %340 = vmatprep.mubr.f32.mxu0 %v56_v20  ;;  %v67_v25 = vld [vmem:[#allocation5 + $0x48] sm:$0xff]  ;;  %v157_v28 = vld [vmem:[#allocation7 + $0x40] sm:$0xff] }
  0x3d   :  { %413 = vmatpush3.bf16.msra.mxu1 %v410_v10  ;;  %375 = vmatprep.mubr.f32.mxu1 %v56_v20  ;;  %v422_v26 = vpack.c.bf16 %v156_v23, %v155_v22  ;;  %v394_v27 = vpack.c.bf16 %v67_v25, %v66_v24  ;;  %v158_v29 = vld [vmem:[#allocation7 + $0x48] sm:$0xff]  ;;  %v68_v30 = vld [vmem:[#allocation5 + $0x50] sm:$0xff]  ;;  %v69_v31 = vld [vmem:[#allocation5 + $0x58] sm:$0xff]  ;;  %p526_p0 = pnand %p525_p13, %p519_p10 }
  0x3e   :  { %385 = vmatpush3.bf16.msra.mxu0 %v382_v5  ;;  %415 = vmatprep.subr.bf16.mxu1 %v414_v16  ;;  %v426_v32 = vpack.c.bf16 %v158_v29, %v157_v28  ;;  %v398_v33 = vpack.c.bf16 %v69_v31, %v68_v30  ;;  %v159_v34 = vld [vmem:[#allocation7 + $0x50] sm:$0xff]  ;;  %v160_v35 = vld [vmem:[#allocation7 + $0x58] sm:$0xff]  ;;  %v70_v36 = vld [vmem:[#allocation5 + $0x60] sm:$0xff] }
  0x3f   :  { %387 = vmatprep.subr.bf16.mxu0 %v386_v12  ;;  %v71_v37 = vld [vmem:[#allocation5 + $0x68] sm:$0xff]  ;;  %v430_v38 = vpack.c.bf16 %v160_v35, %v159_v34  ;;  %v161_v40 = vld [vmem:[#allocation7 + $0x60] sm:$0xff]  ;;  %v72_v42 = vld [vmem:[#allocation5 + $0x70] sm:$0xff] }
  0x40   :  { %v402_v39 = vpack.c.bf16 %v71_v37, %v70_v36  ;;  %v162_v41 = vld [vmem:[#allocation7 + $0x68] sm:$0xff]  ;;  %v73_v43 = vld [vmem:[#allocation5 + $0x78] sm:$0xff]  ;;  %v163_v46 = vld [vmem:[#allocation7 + $0x70] sm:$0xff] }
  0x41   :  { %417 = vmatpush3.bf16.msra.mxu1 %v414_v16  ;;  %v434_v44 = vpack.c.bf16 %v162_v41, %v161_v40  ;;  %v406_v45 = vpack.c.bf16 %v73_v43, %v72_v42  ;;  %v164_v47 = vld [vmem:[#allocation7 + $0x78] sm:$0xff] }
  0x42   :  { %389 = vmatpush3.bf16.msra.mxu0 %v386_v12  ;;  %419 = vmatprep.subr.bf16.mxu1 %v418_v19  ;;  %v438_v48 = vpack.c.bf16 %v164_v47, %v163_v46  ;;  %v57_v49 = vld [vmem:[#allocation2 + $0x8] sm:$0xff] }
  0x43   :  { %391 = vmatprep.subr.bf16.mxu0 %v390_v21 }
  0x45   :  { %421 = vmatpush3.bf16.msra.mxu1 %v418_v19 }
  0x46   :  { %393 = vmatpush3.bf16.msra.mxu0 %v390_v21  ;;  %423 = vmatprep.subr.bf16.mxu1 %v422_v26 }
  0x47   :  { %395 = vmatprep.subr.bf16.mxu0 %v394_v27 }
  0x49   :  { %425 = vmatpush3.bf16.msra.mxu1 %v422_v26 }
  0x4a   :  { %397 = vmatpush3.bf16.msra.mxu0 %v394_v27  ;;  %427 = vmatprep.subr.bf16.mxu1 %v426_v32 }
  0x4b   :  { %399 = vmatprep.subr.bf16.mxu0 %v398_v33 }
  0x4d   :  { %429 = vmatpush3.bf16.msra.mxu1 %v426_v32 }
  0x4e   :  { %401 = vmatpush3.bf16.msra.mxu0 %v398_v33  ;;  %431 = vmatprep.subr.bf16.mxu1 %v430_v38 }
  0x4f   :  { %403 = vmatprep.subr.bf16.mxu0 %v402_v39 }
  0x51   :  { %433 = vmatpush3.bf16.msra.mxu1 %v430_v38 }
  0x52   :  { %405 = vmatpush3.bf16.msra.mxu0 %v402_v39  ;;  %435 = vmatprep.subr.bf16.mxu1 %v434_v44 }
  0x53   :  { %407 = vmatprep.subr.bf16.mxu0 %v406_v45 }
  0x55   :  { %437 = vmatpush3.bf16.msra.mxu1 %v434_v44 }
  0x56   :  { %409 = vmatpush3.bf16.msra.mxu0 %v406_v45  ;;  %439 = vmatprep.subr.bf16.mxu1 %v438_v48 }
  0x59   :  { %341 = vmatmul.mubr.f32.vlgmr.msra.gmra.mrb[0].mxu0 %v57_v49  ;;  %441 = vmatpush3.bf16.msra.mxu1 %v438_v48 }
  0x5c   :  { %376 = vmatmul.mubr.f32.vlgmr.msra.gmra.mrb[0].mxu1 %v57_v49 }
 0x12c   :  { %v342_v50 = vpop.f32.mrb[0].mxu0 }
 0x12d   :  { %v243_v51 = vmul.f32 0.70710677, %v342_v50  ;;  %v140_v52 = vpop.f32.mrb[1].mxu0  ;;  %v241_v58 = vmul.f32 0.5, %v342_v50 }
 0x12e   :  { %v242_v53 = vmul.f32 0.70710677, %v140_v52  ;;  %v240_v60 = vmul.f32 0.5, %v140_v52 }
 0x12f   :  { %448 = verf.f32 %v243_v51  ;;  %v377_v54 = vpop.f32.mrb[0].mxu1 }
 0x130   :  { %450 = verf.f32 %v242_v53  ;;  %v231_v55 = vpop.f32.mrb[1].mxu1 }
 0x139   :  { %v449_v56 = vpop.eup %448 }
 0x13a   :  { %v451_v57 = vpop.eup %450  ;;  %v247_v59 = vadd.f32 1.0, %v449_v56 }
 0x13b   :  { %v246_v61 = vadd.f32 1.0, %v451_v57 }
 0x13c   :  { %v249_v62 = vmul.f32 %v247_v59, %v241_v58 }
 0x13d   :  { %v248_v63 = vmul.f32 %v246_v61, %v240_v60 }
 0x13e   :  { %v251_v0 = vmul.f32 %v377_v54, %v249_v62 }
 0x13f   :  { %v250_v1 = vmul.f32 %v248_v63, %v231_v55 }
 0x140   :  { %253 = vst [vmem:[#allocation8 + $0x8] sm:$0xff] %v251_v0 }
 0x141   :  { %252 = vst [vmem:[#allocation8] sm:$0xff] %v250_v1 }
 0x142   :  { %529 = shalt.err (!%p526_p0)
}
 0x143   :  { %s530_s27 = scalar_lea.hbm %s642_s3, 256 }
 0x144   :  { %p531_p1 = scmp.ne.s32.totalorder %s642_s3, %s530_s27  ;;  %p534_p2 = scmp.lt.u32.totalorder %s530_s27, %s642_s3 }
 0x146   :  { %p536_p3 = pnand %p534_p2, %p531_p1 }
 0x148   :  { %539 = shalt.err (!%p536_p3)
}
 0x149   :  { %265 = dma.vmem_to_hbm [thread:$0]  %s260_s21, 256, %s642_s3, [#allocation4], %s548_s24, %s548_s24, %s549_s25  }
 0x14a   :  { %544 = dma.done.wait [#allocation4], 256  }
 0x14b   :  { %545 = vsyncadd [#allocation4], 4294967040 }
 0x14c   :  { %269 = vsyncpa [#allocation3], 1 }
 0x14d   :  { %270 = vsyncpa [#allocation6], 1 }
 0x14e   :  { %271 = vsyncpa [#allocation4], 1 }

</bundles_post_ra>
